<compile_context>
chip_gen: v6e
topology: v6e:2x2x1
jax: 0.10.0
libtpu: 0.0.40
codegen_flags: <defaults>
</compile_context>

<pallas_src>
import jax
import jax.numpy as jnp
from jax.experimental import pallas as pl
from jax.experimental.pallas import tpu as pltpu

BN_EPS = 1e-5
BN_MOMENTUM = 0.1  # training-time running-stat momentum; unused at inference

ACT_DTYPE = jnp.bfloat16   # streamed activation / weight dtype
ACT_BYTES = 2
OUT_DTYPE = jnp.float32    # keep f32 output for the downstream DCN / upsample
OUT_BYTES = 4


def _round_up(x, m):
    return ((x + m - 1) // m) * m


def _cdiv_int(a, b):
    return -(-a // b)


def _vmem_capacity_bytes():
    """Physical VMEM of the current chip; conservative (v7x, 64 MiB) fallback."""
    try:
        return int(pltpu.get_tpu_info().vmem_capacity_bytes)
    except Exception:
        return 64 * 1024 * 1024


def _choose_tile_m(hw, cin_total, cout, requested, n_batch, vmem_cap):
    """Spatial tile: as large as requested/HW allow while everything resident
    in VMEM — double-buffered bf16 input streams, double-buffered f32 output
    stream, the f32 scratch accumulator, and the (single-buffered) weight and
    shift blocks — stays under ~half the chip's physical VMEM."""
    budget = vmem_cap // 2
    fixed = cout * cin_total * ACT_BYTES + cout * 4           # weights + shift (1x)
    per_col = (2 * cin_total * ACT_BYTES                      # 2x-buffered bf16 inputs
               + 2 * cout * OUT_BYTES                         # 2x-buffered f32 output
               + cout * 4)                                    # f32 scratch accumulator
    avail = max(budget - fixed, 128 * per_col)
    max_tile = max(128, (avail // per_col) // 128 * 128)

    tile = max(128, _round_up(min(requested, hw), 128))
    tile = int(min(tile, max_tile))

    # v7x megacore: keep at least two grid cells when the spatial extent
    # allows it, so ("parallel","parallel") can shard across both TensorCores.
    if n_batch * _cdiv_int(hw, tile) < 2 and hw > 128:
        tile = int(min(tile, max(128, _round_up(_cdiv_int(hw, 2), 128))))
    return tile


def _make_node_kernel(num_children, residual):
    """Kernel for one (batch, spatial-tile) grid cell.

    refs (in order):
      x_0 .. x_{n-1}  : (1, C_i, TM)  bf16 child activation tiles (channel-major)
      w_0 .. w_{n-1}  : (Cout, C_i)   bf16 BN-scale-folded 1x1 conv weight slices
      shift           : (Cout, 1)     f32 folded BN shift
      o               : (1, Cout, TM) f32 output tile
      acc             : (Cout, TM)    f32 VMEM scratch accumulator
    """
    def kernel(*refs):
        xs = refs[:num_children]
        ws = refs[num_children:2 * num_children]
        shift_ref = refs[2 * num_children]
        o_ref = refs[2 * num_children + 1]
        acc_ref = refs[2 * num_children + 2]

        x0 = xs[0][0]                                              # (C0, TM) bf16
        acc_ref[...] = jnp.dot(ws[0][...], x0,
                               preferred_element_type=jnp.float32)
        for i in range(1, num_children):
            acc_ref[...] += jnp.dot(ws[i][...], xs[i][0],
                                    preferred_element_type=jnp.float32)

        # Fused f32 epilogue (shift + residual + ReLU): single read of the
        # accumulator, single cast at the store.  Columns are independent, so
        # the ragged spatial tail (garbage columns past H*W) is safe — it is
        # masked on the output store.
        y = acc_ref[...] + shift_ref[...]                          # (Cout,1) bcast
        if residual:
            y = y + x0.astype(jnp.float32)                         # residual = children[0]
        o_ref[0] = jnp.maximum(y, 0.0).astype(o_ref.dtype)

    return kernel


def node_forward(children, params, residual, *, tile_m=4096):
    """Fused DLA aggregation node.

    children: list of NCHW float32 arrays, same N/H/W.
    params:   'w' (Cout, Cin_total) 1x1 conv weight; 'gamma','beta',
              'running_mean','running_var' each (Cout,).
    residual: add children[0] before ReLU (requires Cout == children[0] channels).
    """
    N, _, H, W = children[0].shape
    hw = H * W
    child_channels = [int(c.shape[1]) for c in children]
    cin_total = sum(child_channels)

    w = params["w"].astype(jnp.float32)                      # (Cout, Cin_total)
    Cout = int(w.shape[0])
    assert int(w.shape[1]) == cin_total
    if residual:
        assert child_channels[0] == Cout, \
            "residual requires out_channels == children[0] channels"

    # Fold inference BN into the conv weight (scale) and a shift vector — in f32
    # on the host; only the streamed copies are bf16.
    inv_std = 1.0 / jnp.sqrt(params["running_var"].astype(jnp.float32) + BN_EPS)
    scale = params["gamma"].astype(jnp.float32) * inv_std                  # (Cout,)
    shift = (params["beta"].astype(jnp.float32)
             - params["running_mean"].astype(jnp.float32) * scale)         # (Cout,)
    w_scaled = w * scale[:, None]                                          # (Cout, Cin_total)

    # Split the (scaled) weight per child — replaces the input concat; bf16 stream.
    w_parts = []
    off = 0
    for ci in child_channels:
        w_parts.append(w_scaled[:, off:off + ci].astype(ACT_DTYPE))
        off += ci

    # NCHW -> (N, C, H*W): free reshape, no transpose; bf16 activation stream.
    xs = [c.reshape(N, ci, hw).astype(ACT_DTYPE)
          for c, ci in zip(children, child_channels)]

    vmem_cap = _vmem_capacity_bytes()
    tile = _choose_tile_m(hw, cin_total, Cout, tile_m, N, vmem_cap)
    grid = (N, pl.cdiv(hw, tile))

    m_total = N * hw
    cost = pl.CostEstimate(
        flops=2 * m_total * cin_total * Cout,
        transcendentals=0,
        bytes_accessed=(ACT_BYTES * m_total * cin_total       # bf16 activations
                        + OUT_BYTES * m_total * Cout          # f32 output
                        + ACT_BYTES * cin_total * Cout        # bf16 weights
                        + 4 * Cout),                          # f32 shift
    )
    compiler_params = pltpu.CompilerParams(
        dimension_semantics=("parallel", "parallel"),
        vmem_limit_bytes=int(vmem_cap * 3 // 4),
    )

    def build(single_buffer_consts):
        x_specs = [pl.BlockSpec((1, ci, tile), lambda n, m: (n, 0, m))
                   for ci in child_channels]
        if single_buffer_consts:
            # Constant blocks: fetch once, no double buffering.
            w_specs = [pl.BlockSpec((Cout, ci), lambda n, m: (0, 0),
                                    pipeline_mode=pl.Buffered(1))
                       for ci in child_channels]
            s_spec = pl.BlockSpec((Cout, 1), lambda n, m: (0, 0),
                                  pipeline_mode=pl.Buffered(1))
        else:
            w_specs = [pl.BlockSpec((Cout, ci), lambda n, m: (0, 0))
                       for ci in child_channels]
            s_spec = pl.BlockSpec((Cout, 1), lambda n, m: (0, 0))
        o_spec = pl.BlockSpec((1, Cout, tile), lambda n, m: (n, 0, m))
        return pl.pallas_call(
            _make_node_kernel(len(children), residual),
            out_shape=jax.ShapeDtypeStruct((N, Cout, hw), OUT_DTYPE),
            grid_spec=pltpu.PrefetchScalarGridSpec(
                num_scalar_prefetch=0,
                grid=grid,
                in_specs=x_specs + w_specs + [s_spec],
                out_specs=o_spec,
                scratch_shapes=[pltpu.VMEM((Cout, tile), jnp.float32)],
            ),
            compiler_params=compiler_params,
            cost_estimate=cost,
        )

    args = (*xs, *w_parts, shift.reshape(Cout, 1))
    try:
        out3d = build(True)(*args)
    except Exception:
        # Fallback if this JAX build rejects pipeline_mode=pl.Buffered(1) on the
        # constant weight/shift blocks — semantics identical, only a little more
        # VMEM is used for their second buffer.
        out3d = build(False)(*args)

    # (N, Cout, H*W) -> NCHW: free reshape.
    return out3d.reshape(N, Cout, H, W)


def node_forward_ref(children, params, residual):
    """Pure-JAX f32 reference for correctness checking."""
    x = jnp.concatenate(children, axis=1)                    # (N, Cin, H, W)
    w = params["w"][:, :, None, None]                        # (Cout, Cin, 1, 1)
    y = jax.lax.conv_general_dilated(
        x, w, window_strides=(1, 1), padding="VALID",
        dimension_numbers=("NCHW", "OIHW", "NCHW"))
    inv_std = 1.0 / jnp.sqrt(params["running_var"] + BN_EPS)
    scale = (params["gamma"] * inv_std)[None, :, None, None]
    shift = (params["beta"]
             - params["running_mean"] * params["gamma"] * inv_std)[None, :, None, None]
    y = y * scale + shift
    if residual:
        y = y + children[0]
    return jnp.maximum(y, 0.0)


if __name__ == "__main__":
    key = jax.random.PRNGKey(0)
    k1, k2, kw = jax.random.split(key, 3)

    # Aggregation node with two children of 4 channels each -> 4 output channels.
    N, H, W = 2, 16, 16
    C1, C2 = 4, 4
    Cin, Cout = C1 + C2, 4
    residual = True

    x1 = jax.random.normal(k1, (N, C1, H, W), dtype=jnp.float32)
    x2 = jax.random.normal(k2, (N, C2, H, W), dtype=jnp.float32)

    # Deterministic synthetic parameters (no checkpoint load).
    w = jax.random.normal(kw, (Cout, Cin), dtype=jnp.float32) * (1.0 / jnp.sqrt(Cin))
    params = {
        "w": w,
        "gamma": 1.0 + 0.01 * jnp.arange(Cout, dtype=jnp.float32),
        "beta": 0.02 * jnp.arange(Cout, dtype=jnp.float32),
        "running_mean": 0.1 * jnp.arange(Cout, dtype=jnp.float32),
        "running_var": 1.0 + 0.05 * jnp.arange(Cout, dtype=jnp.float32),
    }

    out = node_forward([x1, x2], params, residual)
    out = jax.block_until_ready(out)

    ref = node_forward_ref([x1, x2], params, residual)
    assert out.shape == (N, Cout, H, W)
    # bf16-streamed activations/weights vs. the f32 reference: loosened tolerance.
    assert jnp.allclose(out, ref, atol=5e-2, rtol=5e-2), "mismatch vs reference"

    print("KERNEL_OK")
</pallas_src>

<mosaic_0001>
module attributes {stable_mosaic.version = 11 : i64} {
  func.func @kernel(%arg0: i32, %arg1: i32, %arg2: memref<1x4x256xbf16, #tpu.memory_space<vmem>>, %arg3: memref<1x4x256xbf16, #tpu.memory_space<vmem>>, %arg4: memref<4x4xbf16, #tpu.memory_space<vmem>>, %arg5: memref<4x4xbf16, #tpu.memory_space<vmem>>, %arg6: memref<4x1xf32, #tpu.memory_space<vmem>>, %arg7: memref<1x4x256xf32, #tpu.memory_space<vmem>>, %arg8: memref<4x256xf32, #tpu.memory_space<vmem>>) attributes {dimension_semantics = [#tpu.dimension_semantics<parallel>, #tpu.dimension_semantics<parallel>], iteration_bounds = array<i64: 2, 1>, scalar_prefetch = 0 : i64, scratch_operands = 1 : i64, tpu.core_type = #tpu.core_type<tc>, window_params = [{transform_indices = @transform_0, window_bounds = array<i64: 1, 4, 256>}, {transform_indices = @transform_1, window_bounds = array<i64: 1, 4, 256>}, {pipeline_mode = #tpu.pipeline_mode<synchronous>, transform_indices = @transform_2, window_bounds = array<i64: 4, 4>}, {pipeline_mode = #tpu.pipeline_mode<synchronous>, transform_indices = @transform_3, window_bounds = array<i64: 4, 4>}, {pipeline_mode = #tpu.pipeline_mode<synchronous>, transform_indices = @transform_4, window_bounds = array<i64: 4, 1>}, {transform_indices = @transform_5, window_bounds = array<i64: 1, 4, 256>}]} {
    %c0 = arith.constant 0 : index
    %c0_0 = arith.constant 0 : index
    %c0_1 = arith.constant 0 : index
    %0 = vector.load %arg2[%c0, %c0_0, %c0_1] : memref<1x4x256xbf16, #tpu.memory_space<vmem>>, vector<1x4x256xbf16>
    %1 = vector.shape_cast %0 : vector<1x4x256xbf16> to vector<4x256xbf16>
    %c0_2 = arith.constant 0 : index
    %c0_3 = arith.constant 0 : index
    %2 = vector.load %arg4[%c0_2, %c0_3] : memref<4x4xbf16, #tpu.memory_space<vmem>>, vector<4x4xbf16>
    %cst = arith.constant dense<0.000000e+00> : vector<4x256xf32>
    %3 = tpu.matmul %2, %1, %cst {dimension_numbers = #tpu.dot_dimension_numbers<[1], [0], [0], [1], [0, 0, 1, 1], [], []>} : vector<4x4xbf16>, vector<4x256xbf16>, vector<4x256xf32> -> vector<4x256xf32>
    %c0_4 = arith.constant 0 : index
    %c0_5 = arith.constant 0 : index
    %4 = vector.load %arg8[%c0_4, %c0_5] : memref<4x256xf32, #tpu.memory_space<vmem>>, vector<4x256xf32>
    tpu.vector_store %arg8[%c0_4, %c0_5], %3 {strides = array<i32>} : memref<4x256xf32, #tpu.memory_space<vmem>>, vector<4x256xf32>,
    %c0_6 = arith.constant 0 : index
    %c0_7 = arith.constant 0 : index
    %5 = vector.load %arg8[%c0_6, %c0_7] : memref<4x256xf32, #tpu.memory_space<vmem>>, vector<4x256xf32>
    %c0_8 = arith.constant 0 : index
    %c0_9 = arith.constant 0 : index
    %6 = vector.load %arg5[%c0_8, %c0_9] : memref<4x4xbf16, #tpu.memory_space<vmem>>, vector<4x4xbf16>
    %c0_10 = arith.constant 0 : index
    %c0_11 = arith.constant 0 : index
    %c0_12 = arith.constant 0 : index
    %7 = vector.load %arg3[%c0_10, %c0_11, %c0_12] : memref<1x4x256xbf16, #tpu.memory_space<vmem>>, vector<1x4x256xbf16>
    %8 = vector.shape_cast %7 : vector<1x4x256xbf16> to vector<4x256xbf16>
    %cst_13 = arith.constant dense<0.000000e+00> : vector<4x256xf32>
    %9 = tpu.matmul %6, %8, %cst_13 {dimension_numbers = #tpu.dot_dimension_numbers<[1], [0], [0], [1], [0, 0, 1, 1], [], []>} : vector<4x4xbf16>, vector<4x256xbf16>, vector<4x256xf32> -> vector<4x256xf32>
    %10 = arith.addf %5, %9 : vector<4x256xf32>
    %c0_14 = arith.constant 0 : index
    %c0_15 = arith.constant 0 : index
    %11 = vector.load %arg8[%c0_14, %c0_15] : memref<4x256xf32, #tpu.memory_space<vmem>>, vector<4x256xf32>
    tpu.vector_store %arg8[%c0_14, %c0_15], %10 {strides = array<i32>} : memref<4x256xf32, #tpu.memory_space<vmem>>, vector<4x256xf32>,
    %c0_16 = arith.constant 0 : index
    %c0_17 = arith.constant 0 : index
    %12 = vector.load %arg8[%c0_16, %c0_17] : memref<4x256xf32, #tpu.memory_space<vmem>>, vector<4x256xf32>
    %c0_18 = arith.constant 0 : index
    %c0_19 = arith.constant 0 : index
    %13 = vector.load %arg6[%c0_18, %c0_19] : memref<4x1xf32, #tpu.memory_space<vmem>>, vector<4x1xf32>
    %14 = vector.broadcast %13 : vector<4x1xf32> to vector<4x256xf32>
    %15 = arith.addf %12, %14 : vector<4x256xf32>
    %16 = arith.extf %1 : vector<4x256xbf16> to vector<4x256xf32>
    %17 = arith.addf %15, %16 : vector<4x256xf32>
    %cst_20 = arith.constant 0.000000e+00 : f32
    %18 = vector.broadcast %cst_20 : f32 to vector<4x256xf32>
    %19 = arith.maximumf %17, %18 : vector<4x256xf32>
    %c0_21 = arith.constant 0 : index
    %c0_22 = arith.constant 0 : index
    %c0_23 = arith.constant 0 : index
    %20 = vector.load %arg7[%c0_21, %c0_22, %c0_23] : memref<1x4x256xf32, #tpu.memory_space<vmem>>, vector<1x4x256xf32>
    %21 = vector.shape_cast %20 : vector<1x4x256xf32> to vector<4x256xf32>
    %22 = vector.shape_cast %19 : vector<4x256xf32> to vector<1x4x256xf32>
    tpu.vector_store %arg7[%c0_21, %c0_22, %c0_23], %22 {strides = array<i32>} : memref<1x4x256xf32, #tpu.memory_space<vmem>>, vector<1x4x256xf32>,
    return
  }
  func.func @transform_0(%arg0: i32, %arg1: i32) -> (i32, i32, i32) {
    %c0_i32 = arith.constant 0 : i32
    %c0_i32_0 = arith.constant 0 : i32
    return %arg0, %c0_i32, %arg1 : i32, i32, i32
  }
  func.func @transform_1(%arg0: i32, %arg1: i32) -> (i32, i32, i32) {
    %c0_i32 = arith.constant 0 : i32
    %c0_i32_0 = arith.constant 0 : i32
    return %arg0, %c0_i32, %arg1 : i32, i32, i32
  }
  func.func @transform_2(%arg0: i32, %arg1: i32) -> (i32, i32) {
    %c0_i32 = arith.constant 0 : i32
    %c0_i32_0 = arith.constant 0 : i32
    %c0_i32_1 = arith.constant 0 : i32
    return %c0_i32, %c0_i32_0 : i32, i32
  }
  func.func @transform_3(%arg0: i32, %arg1: i32) -> (i32, i32) {
    %c0_i32 = arith.constant 0 : i32
    %c0_i32_0 = arith.constant 0 : i32
    %c0_i32_1 = arith.constant 0 : i32
    return %c0_i32, %c0_i32_0 : i32, i32
  }
  func.func @transform_4(%arg0: i32, %arg1: i32) -> (i32, i32) {
    %c0_i32 = arith.constant 0 : i32
    %c0_i32_0 = arith.constant 0 : i32
    %c0_i32_1 = arith.constant 0 : i32
    return %c0_i32, %c0_i32_0 : i32, i32
  }
  func.func @transform_5(%arg0: i32, %arg1: i32) -> (i32, i32, i32) {
    %c0_i32 = arith.constant 0 : i32
    %c0_i32_0 = arith.constant 0 : i32
    return %arg0, %c0_i32, %arg1 : i32, i32, i32
  }
}

module attributes {stable_mosaic.version = 11 : i64} {
  func.func @kernel(%arg0: i32, %arg1: i32, %arg2: memref<1x4x256xbf16, #tpu.memory_space<vmem>>, %arg3: memref<1x4x256xbf16, #tpu.memory_space<vmem>>, %arg4: memref<4x4xbf16, #tpu.memory_space<vmem>>, %arg5: memref<4x4xbf16, #tpu.memory_space<vmem>>, %arg6: memref<4x1xf32, #tpu.memory_space<vmem>>, %arg7: memref<1x4x256xf32, #tpu.memory_space<vmem>>, %arg8: memref<4x256xf32, #tpu.memory_space<vmem>>) attributes {dimension_semantics = [#tpu.dimension_semantics<parallel>, #tpu.dimension_semantics<parallel>], iteration_bounds = array<i64: 2, 1>, scalar_prefetch = 0 : i64, scratch_operands = 1 : i64, tpu.core_type = #tpu.core_type<tc>, window_params = [{transform_indices = @transform_0, window_bounds = array<i64: 1, 4, 256>}, {transform_indices = @transform_1, window_bounds = array<i64: 1, 4, 256>}, {pipeline_mode = #tpu.pipeline_mode<synchronous>, transform_indices = @transform_2, window_bounds = array<i64: 4, 4>}, {pipeline_mode = #tpu.pipeline_mode<synchronous>, transform_indices = @transform_3, window_bounds = array<i64: 4, 4>}, {pipeline_mode = #tpu.pipeline_mode<synchronous>, transform_indices = @transform_4, window_bounds = array<i64: 4, 1>}, {transform_indices = @transform_5, window_bounds = array<i64: 1, 4, 256>}]} {
    %c0 = arith.constant 0 : index
    %c0_0 = arith.constant 0 : index
    %c0_1 = arith.constant 0 : index
    %0 = vector.load %arg2[%c0, %c0_0, %c0_1] : memref<1x4x256xbf16, #tpu.memory_space<vmem>>, vector<1x4x256xbf16>
    %1 = vector.shape_cast %0 : vector<1x4x256xbf16> to vector<4x256xbf16>
    %c0_2 = arith.constant 0 : index
    %c0_3 = arith.constant 0 : index
    %2 = vector.load %arg4[%c0_2, %c0_3] : memref<4x4xbf16, #tpu.memory_space<vmem>>, vector<4x4xbf16>
    %cst = arith.constant dense<0.000000e+00> : vector<4x256xf32>
    %3 = tpu.matmul %2, %1, %cst {dimension_numbers = #tpu.dot_dimension_numbers<[1], [0], [0], [1], [0, 0, 1, 1], [], []>} : vector<4x4xbf16>, vector<4x256xbf16>, vector<4x256xf32> -> vector<4x256xf32>
    %c0_4 = arith.constant 0 : index
    %c0_5 = arith.constant 0 : index
    %4 = vector.load %arg8[%c0_4, %c0_5] : memref<4x256xf32, #tpu.memory_space<vmem>>, vector<4x256xf32>
    tpu.vector_store %arg8[%c0_4, %c0_5], %3 {strides = array<i32>} : memref<4x256xf32, #tpu.memory_space<vmem>>, vector<4x256xf32>,
    %c0_6 = arith.constant 0 : index
    %c0_7 = arith.constant 0 : index
    %5 = vector.load %arg8[%c0_6, %c0_7] : memref<4x256xf32, #tpu.memory_space<vmem>>, vector<4x256xf32>
    %c0_8 = arith.constant 0 : index
    %c0_9 = arith.constant 0 : index
    %6 = vector.load %arg5[%c0_8, %c0_9] : memref<4x4xbf16, #tpu.memory_space<vmem>>, vector<4x4xbf16>
    %c0_10 = arith.constant 0 : index
    %c0_11 = arith.constant 0 : index
    %c0_12 = arith.constant 0 : index
    %7 = vector.load %arg3[%c0_10, %c0_11, %c0_12] : memref<1x4x256xbf16, #tpu.memory_space<vmem>>, vector<1x4x256xbf16>
    %8 = vector.shape_cast %7 : vector<1x4x256xbf16> to vector<4x256xbf16>
    %cst_13 = arith.constant dense<0.000000e+00> : vector<4x256xf32>
    %9 = tpu.matmul %6, %8, %cst_13 {dimension_numbers = #tpu.dot_dimension_numbers<[1], [0], [0], [1], [0, 0, 1, 1], [], []>} : vector<4x4xbf16>, vector<4x256xbf16>, vector<4x256xf32> -> vector<4x256xf32>
    %10 = arith.addf %5, %9 : vector<4x256xf32>
    %c0_14 = arith.constant 0 : index
    %c0_15 = arith.constant 0 : index
    %11 = vector.load %arg8[%c0_14, %c0_15] : memref<4x256xf32, #tpu.memory_space<vmem>>, vector<4x256xf32>
    tpu.vector_store %arg8[%c0_14, %c0_15], %10 {strides = array<i32>} : memref<4x256xf32, #tpu.memory_space<vmem>>, vector<4x256xf32>,
    %c0_16 = arith.constant 0 : index
    %c0_17 = arith.constant 0 : index
    %12 = vector.load %arg8[%c0_16, %c0_17] : memref<4x256xf32, #tpu.memory_space<vmem>>, vector<4x256xf32>
    %c0_18 = arith.constant 0 : index
    %c0_19 = arith.constant 0 : index
    %13 = vector.load %arg6[%c0_18, %c0_19] : memref<4x1xf32, #tpu.memory_space<vmem>>, vector<4x1xf32>
    %14 = vector.broadcast %13 : vector<4x1xf32> to vector<4x256xf32>
    %15 = arith.addf %12, %14 : vector<4x256xf32>
    %16 = arith.extf %1 : vector<4x256xbf16> to vector<4x256xf32>
    %17 = arith.addf %15, %16 : vector<4x256xf32>
    %cst_20 = arith.constant 0.000000e+00 : f32
    %18 = vector.broadcast %cst_20 : f32 to vector<4x256xf32>
    %19 = arith.maximumf %17, %18 : vector<4x256xf32>
    %c0_21 = arith.constant 0 : index
    %c0_22 = arith.constant 0 : index
    %c0_23 = arith.constant 0 : index
    %20 = vector.load %arg7[%c0_21, %c0_22, %c0_23] : memref<1x4x256xf32, #tpu.memory_space<vmem>>, vector<1x4x256xf32>
    %21 = vector.shape_cast %20 : vector<1x4x256xf32> to vector<4x256xf32>
    %22 = vector.shape_cast %19 : vector<4x256xf32> to vector<1x4x256xf32>
    tpu.vector_store %arg7[%c0_21, %c0_22, %c0_23], %22 {strides = array<i32>} : memref<1x4x256xf32, #tpu.memory_space<vmem>>, vector<1x4x256xf32>,
    return
  }
  func.func @transform_0(%arg0: i32, %arg1: i32) -> (i32, i32, i32) {
    %c0_i32 = arith.constant 0 : i32
    %c0_i32_0 = arith.constant 0 : i32
    return %arg0, %c0_i32, %arg1 : i32, i32, i32
  }
  func.func @transform_1(%arg0: i32, %arg1: i32) -> (i32, i32, i32) {
    %c0_i32 = arith.constant 0 : i32
    %c0_i32_0 = arith.constant 0 : i32
    return %arg0, %c0_i32, %arg1 : i32, i32, i32
  }
  func.func @transform_2(%arg0: i32, %arg1: i32) -> (i32, i32) {
    %c0_i32 = arith.constant 0 : i32
    %c0_i32_0 = arith.constant 0 : i32
    %c0_i32_1 = arith.constant 0 : i32
    return %c0_i32, %c0_i32_0 : i32, i32
  }
  func.func @transform_3(%arg0: i32, %arg1: i32) -> (i32, i32) {
    %c0_i32 = arith.constant 0 : i32
    %c0_i32_0 = arith.constant 0 : i32
    %c0_i32_1 = arith.constant 0 : i32
    return %c0_i32, %c0_i32_0 : i32, i32
  }
  func.func @transform_4(%arg0: i32, %arg1: i32) -> (i32, i32) {
    %c0_i32 = arith.constant 0 : i32
    %c0_i32_0 = arith.constant 0 : i32
    %c0_i32_1 = arith.constant 0 : i32
    return %c0_i32, %c0_i32_0 : i32, i32
  }
  func.func @transform_5(%arg0: i32, %arg1: i32) -> (i32, i32, i32) {
    %c0_i32 = arith.constant 0 : i32
    %c0_i32_0 = arith.constant 0 : i32
    return %arg0, %c0_i32, %arg1 : i32, i32, i32
  }
}

</mosaic_0001>

<bundles_post_ra>
// kernel: tpu_custom_call.1
= control target key start
LH: loop header
LB: loop body
LE: loop exit
PB: predicated region body
PF: predicated region fallthrough
CT: control target
= control target key end

     0   :  { %s1034_s0 = inlined_call_operand.hbm [shape: bf16[2,4,256], index: 0, kind: input, shape index: {}]   ;;  %s1035_s1 = inlined_call_operand.hbm [shape: bf16[2,4,256], index: 1, kind: input, shape index: {}]   ;;  %s1036_s2 = inlined_call_operand.vmem [shape: bf16[4,4], index: 2, kind: input, shape index: {}]   ;;  %s1037_s3 = inlined_call_operand.vmem [shape: bf16[4,4], index: 3, kind: input, shape index: {}]   ;;  %s1038_s4 = inlined_call_operand.vmem [shape: f32[4,1], index: 4, kind: input, shape index: {}]   ;;  %s1039_s5 = inlined_call_operand.hbm [shape: f32[2,4,256], index: 5, kind: output, shape index: {}]  }
   0x1   :  { %1040 = sst [smem:[#allocation12_spill]] %s1034_s0 }
   0x2   :  { %10 = vsyncpa [#allocation4], 0 }
   0x3   :  { %12 = vsyncpa [#allocation4 + $0x1], 0 }
   0x4   :  { %13 = vsyncpa [#allocation7], 0 }
   0x5   :  { %15 = vsyncpa [#allocation7 + $0x1], 0 }
   0x6   :  { %16 = vsyncpa [#allocation5], 0 }
   0x7   :  { %18 = vsyncpa [#allocation5 + $0x1], 0  ;;  %s863_s18 = smov 0   ;;  %s865_s19 = smov 0  }
   0x8   :  { %s867_s20 = smov 0   ;;  %s869_s21 = smov 0  }
   0x9   :  { %s871_s22 = smov 0   ;;  %s873_s23 = smov 0  }
   0xa LB: > { %s587_s24 = sadd.s32 4294967295, %s825_s23   ;;  %s588_s25 = sadd.s32 4294967294, %s825_s23   ;;  %s825_s23 = sphi %s873_s23, %s24_s23   ;;  %s821_s22 = sphi %s871_s22, %s1053_s22   ;;  %s817_s21 = sphi %s869_s21, %s1052_s21   ;;  %s813_s20 = sphi %s867_s20, %s1051_s20   ;;  %s809_s19 = sphi %s865_s19, %s1050_s19   ;;  %s805_s18 = sphi %s863_s18, %s1049_s18  }
   0xb   : > { %s36_s26 = sadd.s32 1, %s821_s22  ;;  %s45_s27 = sadd.s32 1, %s813_s20 }
   0xc   : > { %p38_p0 = scmp.ge.s32.totalorder %s36_s26, 2  ;;  %p52_p1 = scmp.ne.s32.totalorder %s813_s20, %s809_s19 }
   0xd   : > { %p53_p2 = scmp.eq.s32.totalorder %s825_s23, 0  ;;  %p58_p3 = scmp.ne.s32.totalorder %s809_s19, %s805_s18 }
   0xe   : > { %s1055_s26 = smov (%p38_p0, %s36_s26), 0  ;;  %p59_p5 = scmp.eq.s32.totalorder %s587_s24, 0 }
   0xf   : > { %p904_p4 = por %p53_p2, %p52_p1  ;;  %s40_s29 = ssub.s32 %s821_s22, %s1055_s26 }
  0x10   : > { %p175_p6 = scmp.eq.s32.totalorder %s587_s24, 1  ;;  %p43_p7 = scmp.eq.s32.totalorder %s40_s29, 0 }
  0x11   : > { %p910_p8 = por %p59_p5, %p58_p3  ;;  %p181_p10 = scmp.eq.s32.totalorder %s588_s25, 1 }
  0x12   : > { %p914_p9 = por %p175_p6, %p52_p1  ;;  %p631_p13 = scmp.lt.s32.totalorder %s825_s23, 2 }
  0x13   : > { %s919_s7 = scalar_select %p43_p7, %s813_s20, %s45_s27  }
  0x14   : > { %p921_p11 = por %p181_p10, %p58_p3  ;;  %s928_s9 = sand.u32 1, %s813_s20  }
  0x15   : > { %s591_s10 = sshll.u32 %s928_s9, 2  ;;  %s611_s11 = sshll.u32 %s821_s22, 6 }
  0x16   : > { %s1045_s0 = sld [smem:[#allocation12_spill]]  ;;  %s214_s15 = scalar_lea.vmem [#allocation3], %s591_s10 }
  0x17   : > { %s224_s16 = sshll.u32 %s214_s15, 4  ;;  %p937_p0 = pnand %p631_p13, %p904_p4  ;;  %s225_s16 = int_to_ptr.vmem [resolvable:$true] %s224_s16 }
  0x18   : > { %p597_p1 = scmp.ge.s32.totalorder %s825_s23, 1  ;;  %p250_p2 = scmp.lt.s32.totalorder %s825_s23, 3 }
  0x19   : > { %s211_s24 = scalar_lea.sflag [#allocation4], %s928_s9  ;;  %p687_p3 = pneg %p937_p0 }
  0x1a   : > { %s698_s25 = scalar_lea.vmem %s225_s16, 64  ;;  %s827_s27 = smov [#allocation3]  }
  0x1b   : > { %p699_p5 = scmp.ne.s32.totalorder %s225_s16, %s698_s25  ;;  %s703_s29 = sshll.u32 %s827_s27, 4  ;;  %s704_s29 = int_to_ptr.vmem [resolvable:$false] %s703_s29 }
  0x1c   : > { %s222_s14 = scalar_lea.hbm %s1045_s0, %s611_s11  ;;  %s705_s28 = scalar_lea.vmem %s704_s29, 128 }
  0x1d   : > { %p701_p6 = pnand %p699_p5, %p687_p3  ;;  %p706_p4 = scmp.lt.s32.totalorder %s225_s16, %s704_s29 }
  0x1e   : > { %p707_p10 = scmp.lt.s32.totalorder %s705_s28, %s698_s25 }
  0x1f   : > { %p702_p7 = pneg %p701_p6 }
  0x20   : > { %p708_p13 = por %p707_p10, %p706_p4 }
  0x22   : > { %p709_p12 = pnand %p708_p13, %p702_p7 }
  0x24   : > { %712 = shalt.err (!%p709_p12)
}
  0x25   : > { %623 = dma.hbm_to_vmem [thread:$0]  (!%p937_p0), %s222_s14, 64, %s225_s16, %s211_s24  }
  0x26   : > { %p955_p5 = pnand %p597_p1, %p250_p2  ;;  %s243_s25 = scalar_lea.hbm %s1035_s1, %s611_s11 }
  0x27   : > { %s235_s27 = scalar_lea.vmem [#allocation6], %s591_s10  ;;  %s232_s28 = scalar_lea.sflag [#allocation7], %s928_s9 }
  0x28   : > { %s245_s29 = sshll.u32 %s235_s27, 4  ;;  %s828_s14 = smov [#allocation6]   ;;  %s246_s29 = int_to_ptr.vmem [resolvable:$true] %s245_s29 }
  0x29   : > { %s726_s0 = scalar_lea.vmem %s246_s29, 64  ;;  %s731_s16 = sshll.u32 %s828_s14, 4  ;;  %s732_s16 = int_to_ptr.vmem [resolvable:$false] %s731_s16 }
  0x2a   : > { %p727_p12 = scmp.ne.s32.totalorder %s246_s29, %s726_s0  ;;  %s733_s24 = scalar_lea.vmem %s732_s16, 128 }
  0x2b   : > { %p734_p1 = scmp.lt.s32.totalorder %s246_s29, %s732_s16  ;;  %p735_p2 = scmp.lt.s32.totalorder %s733_s24, %s726_s0 }
  0x2c   : > { %p729_p6 = pnand %p727_p12, %p687_p3 }
  0x2d   : > { %p736_p4 = por %p735_p2, %p734_p1 }
  0x2e   : > { %p730_p7 = pneg %p729_p6 }
  0x30   : > { %p737_p10 = pnand %p736_p4, %p730_p7 }
  0x32   : > { %740 = shalt.err (!%p737_p10)
}
  0x33   : > { %626 = dma.hbm_to_vmem [thread:$0]  (!%p937_p0), %s243_s25, 64, %s246_s29, %s232_s28  }
  0x34   : > { %254 = sbr.rel (%p955_p5) target bundleno = 293 (0x125), region = 40  ;;  %s971_s9 = sand.u32 (!%p955_p5), 1, %s809_s19  }
  0x35   : > { %s598_s10 = sshll.u32 (!%p955_p5), %s971_s9, 2  ;;  %s257_s11 = scalar_lea.sflag (!%p955_p5), [#allocation4], %s971_s9 }
  0x36   : > { %s260_s13 = scalar_lea.vmem (!%p955_p5), [#allocation3], %s598_s10 }
  0x39   : > { %792 = dma.done.wait (%p910_p8), %s257_s11, 64  }
  0x3a   : > { %794 = vsyncadd (%p910_p8), %s257_s11, 4294967232  ;;  %s266_s0 = scalar_lea.sflag [#allocation7], %s971_s9  ;;  %s269_s17 = scalar_lea.vmem [#allocation6], %s598_s10 }
  0x3b   : > { %796 = dma.done.wait (%p910_p8), %s266_s0, 64  }
  0x3c   : > { %798 = vsyncadd (%p910_p8), %s266_s0, 4294967232  ;;  %v311_v0 = vlaneseq  ;;  %v829_v1 = vmov 1983009808   ;;  %v830_v3 = vmov 0   ;;  %vm320_vm0 = vcmask 1041408   ;;  %s600_s28 = sshll.u32 %s971_s9, 3 }
  0x3d   : > { %v309_v2 = vunpack.c.l.s4 %v829_v1  ;;  %426 = vmatprep.mubr.bf16.mxu1 %v830_v3  ;;  %359 = vmatprep.mubr.bf16.mxu0 %v830_v3  ;;  %v603_v7 = vld.sshfl [vmem:[%s269_s17] sm:$0x33 pattern:$0x76325410]  ;;  %v305_v8 = vld [vmem:[%s260_s13] sm:$0xf] }
  0x3e   : > { %v312_v4 = vshrl.u32 %v311_v0, 7  ;;  %684 = vset.pattern.permute.xlu0 %v830_v3  ;;  %v384_v9 = vcombine.high %v603_v7, %v603_v7  ;;  %v389_v10 = vsel %vm320_vm0, %v603_v7, 0  ;;  %v442_v12 = vld [vmem:[%s1038_s4] sm:$0xf]  ;;  %vm316_vm1 = vcmask 31744   ;;  %s613_s14 = sshll.u32 %s817_s21, 7 }
  0x3f   : > { %v310_v5 = vunpack.c.0.s8 %v309_v2  ;;  %445 = vperm.xlu0 %684, %v442_v12   ;;  %v374_v15 = vld [vmem:[%s1037_s3] sm:$0x3]  ;;  %v831_v17 = vmov 839922192   ;;  %v456_v32 = vunpack.c.l.bf16 %v305_v8  ;;  %s300_s16 = scalar_lea.vmem [#allocation8], %s600_s28  ;;  %s475_s13 = scalar_lea.hbm %s1039_s5, %s613_s14 }
  0x40   : > { %604 = vmatprep.subr.msk.bf16.mxu1 %vm320_vm0, %v384_v9  ;;  %v306_v16 = vld [vmem:[%s1036_s2] sm:$0x3]  ;;  %v448_v18 = vunpack.c.l.s4 %v831_v17  ;;  %s477_s24 = sshll.u32 %s300_s16, 4  ;;  %s461_s0 = scalar_lea.sflag [#allocation5], %s971_s9  ;;  %s478_s24 = int_to_ptr.vmem [resolvable:$true] %s477_s24 }
  0x41   : > { %v313_v6 = vsub.s32 %v310_v5, %v312_v4  ;;  %409 = vmatpush1.bf16.msra.mxu1 %v389_v10  ;;  %s741_s17 = scalar_lea.vmem %s478_s24, 128  ;;  %s832_s12 = smov [#allocation8]  }
  0x42   : > { %v449_v19 = vunpack.c.0.s8 %v448_v18  ;;  %p742_p8 = scmp.ne.s32.totalorder %s478_s24, %s741_s17  ;;  %s745_s15 = sshll.u32 %s832_s12, 4  ;;  %s746_s15 = int_to_ptr.vmem [resolvable:$false] %s745_s15 }
  0x43   : > { %v314_v11 = vrot.slane %v305_v8, %v313_v6  ;;  %s747_s21 = scalar_lea.vmem %s746_s15, 256  ;;  %p748_p13 = scmp.lt.s32.totalorder %s478_s24, %s746_s15 }
  0x44   : > { %605 = vmatmul.mubr.msk.bf16.vlgmr.msra.gmra.mxu1 %vm316_vm1, %v374_v15  ;;  %v452_v21 = vsub.s32 %v449_v19, %v312_v4  ;;  %p743_p0 = pnand %p742_p8, %p914_p9  ;;  %p749_p5 = scmp.lt.s32.totalorder %s747_s21, %s741_s17 }
  0x45   : > { %v315_v13 = vcombine.high %v314_v11, %v314_v11  ;;  %v322_v14 = vsel %vm320_vm0, %v314_v11, 0 }
  0x46   : > { %p744_p3 = pneg %p743_p0  ;;  %p750_p12 = por %p749_p5, %p748_p13 }
  0x47   : > { %601 = vmatprep.subr.msk.bf16.mxu0 %vm320_vm0, %v315_v13 }
  0x48   : > { %342 = vmatpush1.bf16.msra.mxu0 %v322_v14  ;;  %p751_p6 = pnand %p750_p12, %p744_p3 }
  0x4b   : > { %602 = vmatmul.mubr.msk.bf16.vlgmr.msra.gmra.mxu0 %vm316_vm1, %v306_v16 }
  0xba   : > { %v446_v22 = vpop.permute.xlu0 %445 }
  0xbb   : > { %v453_v29 = vrot.slane %v446_v22, %v452_v21 }
 0x104   : > { %v428_v20 = vpop.f32.mrf.mxu1 }
 0x106   : > { %v430_v24 = vpop.f32.mrf.mxu1 }
 0x107   : > { %v437_v27 = vcombine.low %v428_v20, %v430_v24 }
 0x108   : > { %v432_v26 = vpop.f32.mrf.mxu1 }
 0x10a   : > { %v433_v31 = vpop.f32.mrf.mxu1 }
 0x10b   : > { %v361_v23 = vpop.f32.mrf.mxu0 }
 0x10d   : > { %v363_v25 = vpop.f32.mrf.mxu0 }
 0x10e   : > { %v370_v28 = vcombine.low %v361_v23, %v363_v25 }
 0x10f   : > { %v365_v30 = vpop.f32.mrf.mxu0 }
 0x110   : > { %v439_v33 = vadd.f32 %v437_v27, %v370_v28 }
 0x111   : > { %v366_v34 = vpop.f32.mrf.mxu0 }
 0x112   : > { %v455_v35 = vadd.f32 %v453_v29, %v439_v33 }
 0x114   : > { %v457_v36 = vadd.f32 %v456_v32, %v455_v35 }
 0x116   : > { %v458_v37 = vmax.f32 %v457_v36, 0.0 }
 0x118   : > { %459 = vst [vmem:[%s300_s16] sm:$0xff] %v458_v37 }
 0x119   : > { %754 = shalt.err (!%p751_p6)
}
 0x11a   : > { %s755_s30 = scalar_lea.hbm %s475_s13, 128  ;;  %s759_s27 = scalar_lea.hbm %s1039_s5, 256 }
 0x11b   : > { %p756_p7 = scmp.ne.s32.totalorder %s475_s13, %s755_s30  ;;  %p760_p4 = scmp.lt.s32.totalorder %s475_s13, %s1039_s5 }
 0x11c   : > { %p761_p10 = scmp.lt.s32.totalorder %s759_s27, %s755_s30 }
 0x11d   : > { %p757_p1 = pnand %p756_p7, %p914_p9 }
 0x11e   : > { %p762_p8 = por %p761_p10, %p760_p4 }
 0x11f   : > { %p758_p2 = pneg %p757_p1 }
 0x121   : > { %p763_p0 = pnand %p762_p8, %p758_p2 }
 0x123   : > { %766 = shalt.err (!%p763_p0)
}
 0x124   : > { %618 = dma.vmem_to_hbm [thread:$0]  (%p914_p9), %s478_s24, 128, %s475_s13, %s461_s0  }
 0x125 PF: > { %s489_s14 = sand.u32 1, %s805_s18   ;;  %p1048_p3 = scmp.ge.s32.totalorder %s825_s23, 2 }
 0x126   : > { %s490_s16 = scalar_lea.sflag [#allocation5], %s489_s14 }
 0x127   : > { %p628_p13 = pnand %p1048_p3, %p921_p11 }
 0x129   : > { %p629_p5 = pneg %p628_p13 }
 0x12b   : > { %800 = dma.done.wait (%p629_p5), %s490_s16, 128  }
 0x12c   : > { %802 = vsyncadd (%p629_p5), %s490_s16, 4294967168  ;;  %s24_s23 = sadd.s32 1, %s825_s23   ;;  %s1049_s18 = smov %s809_s19 }
 0x12d   : > { %p21_p12 = scmp.ge.s32.totalorder %s24_s23, 4   ;;  %s1050_s19 = smov %s813_s20 }
 0x12e   : > { %s1051_s20 = smov %s919_s7  ;;  %s1052_s21 = smov %s821_s22 }
 0x12f   : > { %s1053_s22 = smov %s1055_s26  ;;  %23 = sbr.rel (!%p21_p12) target bundleno = 10 (0xa), region = 98 }
 0x134   :  { %495 = vsyncpa [#allocation4], 1 }
 0x135   :  { %497 = vsyncpa [#allocation4 + $0x1], 1 }
 0x136   :  { %498 = vsyncpa [#allocation7], 1 }
 0x137   :  { %500 = vsyncpa [#allocation7 + $0x1], 1 }
 0x138   :  { %501 = vsyncpa [#allocation5], 1 }
 0x139   :  { %503 = vsyncpa [#allocation5 + $0x1], 1 }

// kernel: tpu_custom_call.1
= control target key start
LH: loop header
LB: loop body
LE: loop exit
PB: predicated region body
PF: predicated region fallthrough
CT: control target
= control target key end

     0   :  { %s1034_s0 = inlined_call_operand.hbm [shape: bf16[2,4,256], index: 0, kind: input, shape index: {}]   ;;  %s1035_s1 = inlined_call_operand.hbm [shape: bf16[2,4,256], index: 1, kind: input, shape index: {}]   ;;  %s1036_s2 = inlined_call_operand.vmem [shape: bf16[4,4], index: 2, kind: input, shape index: {}]   ;;  %s1037_s3 = inlined_call_operand.vmem [shape: bf16[4,4], index: 3, kind: input, shape index: {}]   ;;  %s1038_s4 = inlined_call_operand.vmem [shape: f32[4,1], index: 4, kind: input, shape index: {}]   ;;  %s1039_s5 = inlined_call_operand.hbm [shape: f32[2,4,256], index: 5, kind: output, shape index: {}]  }
   0x1   :  { %1040 = sst [smem:[#allocation12_spill]] %s1034_s0 }
   0x2   :  { %10 = vsyncpa [#allocation4], 0 }
   0x3   :  { %12 = vsyncpa [#allocation4 + $0x1], 0 }
   0x4   :  { %13 = vsyncpa [#allocation7], 0 }
   0x5   :  { %15 = vsyncpa [#allocation7 + $0x1], 0 }
   0x6   :  { %16 = vsyncpa [#allocation5], 0 }
   0x7   :  { %18 = vsyncpa [#allocation5 + $0x1], 0  ;;  %s863_s18 = smov 0   ;;  %s865_s19 = smov 0  }
   0x8   :  { %s867_s20 = smov 0   ;;  %s869_s21 = smov 0  }
   0x9   :  { %s871_s22 = smov 0   ;;  %s873_s23 = smov 0  }
   0xa LB: > { %s587_s24 = sadd.s32 4294967295, %s825_s23   ;;  %s588_s25 = sadd.s32 4294967294, %s825_s23   ;;  %s825_s23 = sphi %s873_s23, %s24_s23   ;;  %s821_s22 = sphi %s871_s22, %s1053_s22   ;;  %s817_s21 = sphi %s869_s21, %s1052_s21   ;;  %s813_s20 = sphi %s867_s20, %s1051_s20   ;;  %s809_s19 = sphi %s865_s19, %s1050_s19   ;;  %s805_s18 = sphi %s863_s18, %s1049_s18  }
   0xb   : > { %s36_s26 = sadd.s32 1, %s821_s22  ;;  %s45_s27 = sadd.s32 1, %s813_s20 }
   0xc   : > { %p38_p0 = scmp.ge.s32.totalorder %s36_s26, 2  ;;  %p52_p1 = scmp.ne.s32.totalorder %s813_s20, %s809_s19 }
   0xd   : > { %p53_p2 = scmp.eq.s32.totalorder %s825_s23, 0  ;;  %p58_p3 = scmp.ne.s32.totalorder %s809_s19, %s805_s18 }
   0xe   : > { %s1055_s26 = smov (%p38_p0, %s36_s26), 0  ;;  %p59_p5 = scmp.eq.s32.totalorder %s587_s24, 0 }
   0xf   : > { %p904_p4 = por %p53_p2, %p52_p1  ;;  %s40_s29 = ssub.s32 %s821_s22, %s1055_s26 }
  0x10   : > { %p175_p6 = scmp.eq.s32.totalorder %s587_s24, 1  ;;  %p43_p7 = scmp.eq.s32.totalorder %s40_s29, 0 }
  0x11   : > { %p910_p8 = por %p59_p5, %p58_p3  ;;  %p181_p10 = scmp.eq.s32.totalorder %s588_s25, 1 }
  0x12   : > { %p914_p9 = por %p175_p6, %p52_p1  ;;  %p631_p13 = scmp.lt.s32.totalorder %s825_s23, 2 }
  0x13   : > { %s919_s7 = scalar_select %p43_p7, %s813_s20, %s45_s27  }
  0x14   : > { %p921_p11 = por %p181_p10, %p58_p3  ;;  %s928_s9 = sand.u32 1, %s813_s20  }
  0x15   : > { %s591_s10 = sshll.u32 %s928_s9, 2  ;;  %s611_s11 = sshll.u32 %s821_s22, 6 }
  0x16   : > { %s1045_s0 = sld [smem:[#allocation12_spill]]  ;;  %s214_s15 = scalar_lea.vmem [#allocation3], %s591_s10 }
  0x17   : > { %s224_s16 = sshll.u32 %s214_s15, 4  ;;  %p937_p0 = pnand %p631_p13, %p904_p4  ;;  %s225_s16 = int_to_ptr.vmem [resolvable:$true] %s224_s16 }
  0x18   : > { %p597_p1 = scmp.ge.s32.totalorder %s825_s23, 1  ;;  %p250_p2 = scmp.lt.s32.totalorder %s825_s23, 3 }
  0x19   : > { %s211_s24 = scalar_lea.sflag [#allocation4], %s928_s9  ;;  %p687_p3 = pneg %p937_p0 }
  0x1a   : > { %s698_s25 = scalar_lea.vmem %s225_s16, 64  ;;  %s827_s27 = smov [#allocation3]  }
  0x1b   : > { %p699_p5 = scmp.ne.s32.totalorder %s225_s16, %s698_s25  ;;  %s703_s29 = sshll.u32 %s827_s27, 4  ;;  %s704_s29 = int_to_ptr.vmem [resolvable:$false] %s703_s29 }
  0x1c   : > { %s222_s14 = scalar_lea.hbm %s1045_s0, %s611_s11  ;;  %s705_s28 = scalar_lea.vmem %s704_s29, 128 }
  0x1d   : > { %p701_p6 = pnand %p699_p5, %p687_p3  ;;  %p706_p4 = scmp.lt.s32.totalorder %s225_s16, %s704_s29 }
  0x1e   : > { %p707_p10 = scmp.lt.s32.totalorder %s705_s28, %s698_s25 }
  0x1f   : > { %p702_p7 = pneg %p701_p6 }
  0x20   : > { %p708_p13 = por %p707_p10, %p706_p4 }
  0x22   : > { %p709_p12 = pnand %p708_p13, %p702_p7 }
  0x24   : > { %712 = shalt.err (!%p709_p12)
}
  0x25   : > { %623 = dma.hbm_to_vmem [thread:$0]  (!%p937_p0), %s222_s14, 64, %s225_s16, %s211_s24  }
  0x26   : > { %p955_p5 = pnand %p597_p1, %p250_p2  ;;  %s243_s25 = scalar_lea.hbm %s1035_s1, %s611_s11 }
  0x27   : > { %s235_s27 = scalar_lea.vmem [#allocation6], %s591_s10  ;;  %s232_s28 = scalar_lea.sflag [#allocation7], %s928_s9 }
  0x28   : > { %s245_s29 = sshll.u32 %s235_s27, 4  ;;  %s828_s14 = smov [#allocation6]   ;;  %s246_s29 = int_to_ptr.vmem [resolvable:$true] %s245_s29 }
  0x29   : > { %s726_s0 = scalar_lea.vmem %s246_s29, 64  ;;  %s731_s16 = sshll.u32 %s828_s14, 4  ;;  %s732_s16 = int_to_ptr.vmem [resolvable:$false] %s731_s16 }
  0x2a   : > { %p727_p12 = scmp.ne.s32.totalorder %s246_s29, %s726_s0  ;;  %s733_s24 = scalar_lea.vmem %s732_s16, 128 }
  0x2b   : > { %p734_p1 = scmp.lt.s32.totalorder %s246_s29, %s732_s16  ;;  %p735_p2 = scmp.lt.s32.totalorder %s733_s24, %s726_s0 }
  0x2c   : > { %p729_p6 = pnand %p727_p12, %p687_p3 }
  0x2d   : > { %p736_p4 = por %p735_p2, %p734_p1 }
  0x2e   : > { %p730_p7 = pneg %p729_p6 }
  0x30   : > { %p737_p10 = pnand %p736_p4, %p730_p7 }
  0x32   : > { %740 = shalt.err (!%p737_p10)
}
  0x33   : > { %626 = dma.hbm_to_vmem [thread:$0]  (!%p937_p0), %s243_s25, 64, %s246_s29, %s232_s28  }
  0x34   : > { %254 = sbr.rel (%p955_p5) target bundleno = 293 (0x125), region = 40  ;;  %s971_s9 = sand.u32 (!%p955_p5), 1, %s809_s19  }
  0x35   : > { %s598_s10 = sshll.u32 (!%p955_p5), %s971_s9, 2  ;;  %s257_s11 = scalar_lea.sflag (!%p955_p5), [#allocation4], %s971_s9 }
  0x36   : > { %s260_s13 = scalar_lea.vmem (!%p955_p5), [#allocation3], %s598_s10 }
  0x39   : > { %792 = dma.done.wait (%p910_p8), %s257_s11, 64  }
  0x3a   : > { %794 = vsyncadd (%p910_p8), %s257_s11, 4294967232  ;;  %s266_s0 = scalar_lea.sflag [#allocation7], %s971_s9  ;;  %s269_s17 = scalar_lea.vmem [#allocation6], %s598_s10 }
  0x3b   : > { %796 = dma.done.wait (%p910_p8), %s266_s0, 64  }
  0x3c   : > { %798 = vsyncadd (%p910_p8), %s266_s0, 4294967232  ;;  %v311_v0 = vlaneseq  ;;  %v829_v1 = vmov 1983009808   ;;  %v830_v3 = vmov 0   ;;  %vm320_vm0 = vcmask 1041408   ;;  %s600_s28 = sshll.u32 %s971_s9, 3 }
  0x3d   : > { %v309_v2 = vunpack.c.l.s4 %v829_v1  ;;  %426 = vmatprep.mubr.bf16.mxu1 %v830_v3  ;;  %359 = vmatprep.mubr.bf16.mxu0 %v830_v3  ;;  %v603_v7 = vld.sshfl [vmem:[%s269_s17] sm:$0x33 pattern:$0x76325410]  ;;  %v305_v8 = vld [vmem:[%s260_s13] sm:$0xf] }
  0x3e   : > { %v312_v4 = vshrl.u32 %v311_v0, 7  ;;  %684 = vset.pattern.permute.xlu0 %v830_v3  ;;  %v384_v9 = vcombine.high %v603_v7, %v603_v7  ;;  %v389_v10 = vsel %vm320_vm0, %v603_v7, 0  ;;  %v442_v12 = vld [vmem:[%s1038_s4] sm:$0xf]  ;;  %vm316_vm1 = vcmask 31744   ;;  %s613_s14 = sshll.u32 %s817_s21, 7 }
  0x3f   : > { %v310_v5 = vunpack.c.0.s8 %v309_v2  ;;  %445 = vperm.xlu0 %684, %v442_v12   ;;  %v374_v15 = vld [vmem:[%s1037_s3] sm:$0x3]  ;;  %v831_v17 = vmov 839922192   ;;  %v456_v32 = vunpack.c.l.bf16 %v305_v8  ;;  %s300_s16 = scalar_lea.vmem [#allocation8], %s600_s28  ;;  %s475_s13 = scalar_lea.hbm %s1039_s5, %s613_s14 }
  0x40   : > { %604 = vmatprep.subr.msk.bf16.mxu1 %vm320_vm0, %v384_v9  ;;  %v306_v16 = vld [vmem:[%s1036_s2] sm:$0x3]  ;;  %v448_v18 = vunpack.c.l.s4 %v831_v17  ;;  %s477_s24 = sshll.u32 %s300_s16, 4  ;;  %s461_s0 = scalar_lea.sflag [#allocation5], %s971_s9  ;;  %s478_s24 = int_to_ptr.vmem [resolvable:$true] %s477_s24 }
  0x41   : > { %v313_v6 = vsub.s32 %v310_v5, %v312_v4  ;;  %409 = vmatpush1.bf16.msra.mxu1 %v389_v10  ;;  %s741_s17 = scalar_lea.vmem %s478_s24, 128  ;;  %s832_s12 = smov [#allocation8]  }
  0x42   : > { %v449_v19 = vunpack.c.0.s8 %v448_v18  ;;  %p742_p8 = scmp.ne.s32.totalorder %s478_s24, %s741_s17  ;;  %s745_s15 = sshll.u32 %s832_s12, 4  ;;  %s746_s15 = int_to_ptr.vmem [resolvable:$false] %s745_s15 }
  0x43   : > { %v314_v11 = vrot.slane %v305_v8, %v313_v6  ;;  %s747_s21 = scalar_lea.vmem %s746_s15, 256  ;;  %p748_p13 = scmp.lt.s32.totalorder %s478_s24, %s746_s15 }
  0x44   : > { %605 = vmatmul.mubr.msk.bf16.vlgmr.msra.gmra.mxu1 %vm316_vm1, %v374_v15  ;;  %v452_v21 = vsub.s32 %v449_v19, %v312_v4  ;;  %p743_p0 = pnand %p742_p8, %p914_p9  ;;  %p749_p5 = scmp.lt.s32.totalorder %s747_s21, %s741_s17 }
  0x45   : > { %v315_v13 = vcombine.high %v314_v11, %v314_v11  ;;  %v322_v14 = vsel %vm320_vm0, %v314_v11, 0 }
  0x46   : > { %p744_p3 = pneg %p743_p0  ;;  %p750_p12 = por %p749_p5, %p748_p13 }
  0x47   : > { %601 = vmatprep.subr.msk.bf16.mxu0 %vm320_vm0, %v315_v13 }
  0x48   : > { %342 = vmatpush1.bf16.msra.mxu0 %v322_v14  ;;  %p751_p6 = pnand %p750_p12, %p744_p3 }
  0x4b   : > { %602 = vmatmul.mubr.msk.bf16.vlgmr.msra.gmra.mxu0 %vm316_vm1, %v306_v16 }
  0xba   : > { %v446_v22 = vpop.permute.xlu0 %445 }
  0xbb   : > { %v453_v29 = vrot.slane %v446_v22, %v452_v21 }
 0x104   : > { %v428_v20 = vpop.f32.mrf.mxu1 }
 0x106   : > { %v430_v24 = vpop.f32.mrf.mxu1 }
 0x107   : > { %v437_v27 = vcombine.low %v428_v20, %v430_v24 }
 0x108   : > { %v432_v26 = vpop.f32.mrf.mxu1 }
 0x10a   : > { %v433_v31 = vpop.f32.mrf.mxu1 }
 0x10b   : > { %v361_v23 = vpop.f32.mrf.mxu0 }
 0x10d   : > { %v363_v25 = vpop.f32.mrf.mxu0 }
 0x10e   : > { %v370_v28 = vcombine.low %v361_v23, %v363_v25 }
 0x10f   : > { %v365_v30 = vpop.f32.mrf.mxu0 }
 0x110   : > { %v439_v33 = vadd.f32 %v437_v27, %v370_v28 }
 0x111   : > { %v366_v34 = vpop.f32.mrf.mxu0 }
 0x112   : > { %v455_v35 = vadd.f32 %v453_v29, %v439_v33 }
 0x114   : > { %v457_v36 = vadd.f32 %v456_v32, %v455_v35 }
 0x116   : > { %v458_v37 = vmax.f32 %v457_v36, 0.0 }
 0x118   : > { %459 = vst [vmem:[%s300_s16] sm:$0xff] %v458_v37 }
 0x119   : > { %754 = shalt.err (!%p751_p6)
}
 0x11a   : > { %s755_s30 = scalar_lea.hbm %s475_s13, 128  ;;  %s759_s27 = scalar_lea.hbm %s1039_s5, 256 }
 0x11b   : > { %p756_p7 = scmp.ne.s32.totalorder %s475_s13, %s755_s30  ;;  %p760_p4 = scmp.lt.s32.totalorder %s475_s13, %s1039_s5 }
 0x11c   : > { %p761_p10 = scmp.lt.s32.totalorder %s759_s27, %s755_s30 }
 0x11d   : > { %p757_p1 = pnand %p756_p7, %p914_p9 }
 0x11e   : > { %p762_p8 = por %p761_p10, %p760_p4 }
 0x11f   : > { %p758_p2 = pneg %p757_p1 }
 0x121   : > { %p763_p0 = pnand %p762_p8, %p758_p2 }
 0x123   : > { %766 = shalt.err (!%p763_p0)
}
 0x124   : > { %618 = dma.vmem_to_hbm [thread:$0]  (%p914_p9), %s478_s24, 128, %s475_s13, %s461_s0  }
 0x125 PF: > { %s489_s14 = sand.u32 1, %s805_s18   ;;  %p1048_p3 = scmp.ge.s32.totalorder %s825_s23, 2 }
 0x126   : > { %s490_s16 = scalar_lea.sflag [#allocation5], %s489_s14 }
 0x127   : > { %p628_p13 = pnand %p1048_p3, %p921_p11 }
 0x129   : > { %p629_p5 = pneg %p628_p13 }
 0x12b   : > { %800 = dma.done.wait (%p629_p5), %s490_s16, 128  }
 0x12c   : > { %802 = vsyncadd (%p629_p5), %s490_s16, 4294967168  ;;  %s24_s23 = sadd.s32 1, %s825_s23   ;;  %s1049_s18 = smov %s809_s19 }
 0x12d   : > { %p21_p12 = scmp.ge.s32.totalorder %s24_s23, 4   ;;  %s1050_s19 = smov %s813_s20 }
 0x12e   : > { %s1051_s20 = smov %s919_s7  ;;  %s1052_s21 = smov %s821_s22 }
 0x12f   : > { %s1053_s22 = smov %s1055_s26  ;;  %23 = sbr.rel (!%p21_p12) target bundleno = 10 (0xa), region = 98 }
 0x134   :  { %495 = vsyncpa [#allocation4], 1 }
 0x135   :  { %497 = vsyncpa [#allocation4 + $0x1], 1 }
 0x136   :  { %498 = vsyncpa [#allocation7], 1 }
 0x137   :  { %500 = vsyncpa [#allocation7 + $0x1], 1 }
 0x138   :  { %501 = vsyncpa [#allocation5], 1 }
 0x139   :  { %503 = vsyncpa [#allocation5 + $0x1], 1 }

</bundles_post_ra>
